<compile_context>
chip_gen: v5e
topology: v5e:2x2
jax: 0.10.0
libtpu: 0.0.40
codegen_flags: <defaults>
</compile_context>

<pallas_src>
import jax
import jax.numpy as jnp
from jax.experimental import pallas as pl
from jax.experimental.pallas import tpu as pltpu

BETA = 0.5        # args['beta'], deterministic in-script value
PAD_IDX = 1       # dictionary.pad() — unused in the forward pass, kept for parity

_ROW_ALIGN = 32   # sublane-safe row multiple for f32 / bf16 / int8 blocks


def _cdiv(a, b):
    return -(-a // b)


def _round_up(a, b):
    return _cdiv(a, b) * b


def _hw_config():
    """Generation-aware shard count and VMEM budgets."""
    kind = ""
    try:
        kind = jax.devices()[0].device_kind.lower()
    except Exception:
        pass
    if "v7" in kind:
        # v7x: 2 TensorCores/chip (each with its own ~3.2 TB/s HBM path) but
        # only 64 MiB VMEM per core -> accumulator-free, tighter tiling.
        return {"num_shards": 2, "vmem_budget": 30 << 20, "vmem_limit": 40 << 20}
    # v5e / v6e: single TensorCore, 128 MiB physical VMEM.  Big tiles keep the
    # ~0.35 us per-grid-step overhead well under the HBM time per step.
    return {"num_shards": 1, "vmem_budget": 64 << 20, "vmem_limit": 96 << 20}


def _choose_tile_rows(rows_per_shard, d, emb_itemsize, vmem_budget):
    """Largest aligned row tile whose double-buffered working set fits the budget."""
    d_pad = _round_up(d, 128)  # VMEM lane padding of the embedding blocks
    # 2 embedding inputs x 2 pipeline buffers x D_pad x itemsize      per row
    # + mask block: (rows, 1) is lane-padded to 128 lanes in VMEM
    #   -> 512 B/row per buffer x 2 buffers                           per row
    # + (rows, 1) f32 accumulator scratch, also lane-padded           per row
    per_row = 4 * d_pad * emb_itemsize + 2 * 512 + 512
    t = vmem_budget // per_row
    t = min(t, _round_up(rows_per_shard, _ROW_ALIGN))  # don't tile past the data
    t = (t // _ROW_ALIGN) * _ROW_ALIGN
    return max(t, _ROW_ALIGN)


def _make_kernel(n_rows, tile_rows, tiles_per_shard, needs_tail_mask):
    def kernel(g_ref, p_ref, m_ref, out_ref, acc_ref):
        # g_ref, p_ref : (tile_rows, D)   embeddings (input dtype)
        # m_ref        : (tile_rows, 1)   non-pad mask (caller dtype)
        # out_ref      : (1, 8, 128)      per-shard partial sum (f32)
        # acc_ref      : (tile_rows, 1)   f32 per-row accumulator scratch
        s = pl.program_id(0)
        i = pl.program_id(1)

        @pl.when(i == 0)
        def _():
            acc_ref[...] = jnp.zeros_like(acc_ref)

        diff = g_ref[...].astype(jnp.float32) - p_ref[...].astype(jnp.float32)
        # Per-row reduction over D goes to the XLU slot; VPU work per element
        # is just sub + mul.  Mask is applied AFTER the reduce (per row).
        row = jnp.sum(diff * diff, axis=-1, keepdims=True)       # (tile_rows, 1)
        contrib = m_ref[...].astype(jnp.float32) * row

        if needs_tail_mask:
            # Ragged tail handled in-kernel (no wrapper jnp.pad): rows whose
            # global index is >= n_rows were DMA'd as unspecified data; select
            # 0 for them.  jnp.where is a lane select, so garbage NaN/Inf in
            # the discarded branch is harmless.
            row0 = (s * tiles_per_shard + i) * tile_rows
            rid = row0 + jax.lax.broadcasted_iota(jnp.int32, (tile_rows, 1), 0)
            contrib = jnp.where(rid < n_rows, contrib, 0.0)

        acc_ref[...] += contrib

        @pl.when(i == tiles_per_shard - 1)
        def _():
            # Single cross-sublane reduction per shard, once per stream.
            total = jnp.sum(acc_ref[...])
            out_ref[...] = jnp.broadcast_to(total, out_ref.shape)

    return kernel


def feature_regularizer(gold_embed, predict_embed, non_pad_mask, *, beta=BETA,
                        tile_rows=None):
    """gold_embed, predict_embed: [B, T, D]; non_pad_mask: [B, T]. Returns scalar f32."""
    B, T, D = gold_embed.shape
    N = B * T

    g = gold_embed.reshape(N, D)
    p = predict_embed.reshape(N, D)
    m = non_pad_mask.reshape(N, 1)
    if m.dtype == jnp.bool_:
        # i1 blocks have awkward layouts; a 1-byte integer mask keeps the mask
        # DMA narrow while staying layout-friendly.  Cast to f32 happens
        # in-kernel, after the per-row reduce.
        m = m.astype(jnp.int8)

    hw = _hw_config()
    num_shards = hw["num_shards"]
    if num_shards > 1 and N < num_shards * _ROW_ALIGN:
        num_shards = 1                      # too little data to shard usefully

    rows_per_shard = _cdiv(N, num_shards)
    if tile_rows is None:
        tile_rows = _choose_tile_rows(rows_per_shard, D, g.dtype.itemsize,
                                      hw["vmem_budget"])
    tiles_per_shard = _cdiv(rows_per_shard, tile_rows)
    needs_tail_mask = (num_shards * tiles_per_shard * tile_rows) != N

    def row_map(s, i):
        return (s * tiles_per_shard + i, 0)

    kernel = _make_kernel(N, tile_rows, tiles_per_shard, needs_tail_mask)

    if num_shards > 1:
        # v7x: genuinely split the row stream across the two TensorCores
        # (each has its own HBM path); plain "parallel" may not shard cores.
        dim_sem = (pltpu.CORE_PARALLEL, pltpu.ARBITRARY)
    else:
        dim_sem = ("arbitrary", "arbitrary")

    # Advisory-only: lets XLA overlap surrounding ops with this purely
    # bandwidth-bound custom call.
    cost = pl.CostEstimate(
        flops=4 * N * D,
        transcendentals=0,
        bytes_accessed=(2 * N * D * g.dtype.itemsize
                        + N * m.dtype.itemsize
                        + num_shards * 8 * 128 * 4),
    )

    partials = pl.pallas_call(
        kernel,
        out_shape=jax.ShapeDtypeStruct((num_shards, 8, 128), jnp.float32),
        grid_spec=pltpu.PrefetchScalarGridSpec(
            num_scalar_prefetch=0,
            grid=(num_shards, tiles_per_shard),
            # Note: on v7x, if a trace shows exposed DMA gaps at ~2.5 us/step,
            # sweep pipeline_mode=pl.Buffered(3) on the two embedding specs.
            in_specs=[
                pl.BlockSpec((tile_rows, D), row_map),
                pl.BlockSpec((tile_rows, D), row_map),
                pl.BlockSpec((tile_rows, 1), row_map),
            ],
            # (8,128)-aligned per-shard output block; written once per shard.
            out_specs=pl.BlockSpec((1, 8, 128), lambda s, i: (s, 0, 0)),
            scratch_shapes=[pltpu.VMEM((tile_rows, 1), jnp.float32)],
        ),
        compiler_params=pltpu.CompilerParams(
            dimension_semantics=dim_sem,
            vmem_limit_bytes=hw["vmem_limit"],
        ),
        cost_estimate=cost,
    )(g, p, m)

    # Sum the per-shard partials and apply beta on the XLA side.
    return jnp.sum(partials[:, 0, 0]) * jnp.float32(beta)


def feature_regularizer_ref(gold_embed, predict_embed, non_pad_mask, beta=BETA):
    dist = jnp.sum((gold_embed.astype(jnp.float32)
                    - predict_embed.astype(jnp.float32)) ** 2, axis=-1)
    reg = non_pad_mask.astype(jnp.float32) * dist
    return jnp.sum(reg) * beta


if __name__ == "__main__":
    key = jax.random.PRNGKey(0)
    k1, k2, k3, _ = jax.random.split(key, 4)

    # Test 1: f32 embeddings, small shapes (exercises in-kernel tail masking
    # since N=16 < tile_rows=32 — no jnp.pad anywhere).
    B, T, D = 2, 8, 32
    gold = jax.random.normal(k1, (B, T, D), dtype=jnp.float32)
    pred = jax.random.normal(k2, (B, T, D), dtype=jnp.float32)
    mask = (jax.random.uniform(k3, (B, T)) > 0.25).astype(jnp.float32)

    out = jax.block_until_ready(feature_regularizer(gold, pred, mask))
    ref = feature_regularizer_ref(gold, pred, mask)
    assert jnp.allclose(out, ref, rtol=1e-5, atol=1e-5), (out, ref)

    # Test 2: odd sequence length (another ragged row count).
    T2 = 7
    gold2, pred2, mask2 = gold[:, :T2], pred[:, :T2], mask[:, :T2]
    out2 = jax.block_until_ready(feature_regularizer(gold2, pred2, mask2))
    ref2 = feature_regularizer_ref(gold2, pred2, mask2)
    assert jnp.allclose(out2, ref2, rtol=1e-5, atol=1e-5), (out2, ref2)

    # Test 3: bf16 embeddings streamed as bf16 (kernel upcasts to f32).
    gold_bf = gold.astype(jnp.bfloat16)
    pred_bf = pred.astype(jnp.bfloat16)
    out3 = jax.block_until_ready(feature_regularizer(gold_bf, pred_bf, mask))
    ref3 = feature_regularizer_ref(gold_bf, pred_bf, mask)
    assert jnp.allclose(out3, ref3, rtol=5e-3, atol=5e-3), (out3, ref3)

    print("KERNEL_OK")
</pallas_src>

<mosaic_0001>
module attributes {stable_mosaic.version = 11 : i64} {
  func.func @kernel(%arg0: i32, %arg1: i32, %arg2: memref<32x32xf32, #tpu.memory_space<vmem>>, %arg3: memref<32x32xf32, #tpu.memory_space<vmem>>, %arg4: memref<32x1xf32, #tpu.memory_space<vmem>>, %arg5: memref<1x8x128xf32, #tpu.memory_space<vmem>>, %arg6: memref<32x1xf32, #tpu.memory_space<vmem>>) attributes {dimension_semantics = [#tpu.dimension_semantics<arbitrary>, #tpu.dimension_semantics<arbitrary>], iteration_bounds = array<i64: 1, 1>, scalar_prefetch = 0 : i64, scratch_operands = 1 : i64, tpu.core_type = #tpu.core_type<tc>, window_params = [{transform_indices = @transform_0, window_bounds = array<i64: 32, 32>}, {transform_indices = @transform_1, window_bounds = array<i64: 32, 32>}, {transform_indices = @transform_2, window_bounds = array<i64: 32, 1>}, {transform_indices = @transform_3, window_bounds = array<i64: 1, 8, 128>}]} {
    %c0_i32 = arith.constant 0 : i32
    %0 = arith.cmpi eq, %arg1, %c0_i32 : i32
    %1 = arith.extui %0 : i1 to i32
    %c0_i32_0 = arith.constant 0 : i32
    %2 = arith.cmpi ne, %1, %c0_i32_0 : i32
    scf.if %2 {
      %cst_13 = arith.constant 0.000000e+00 : f32
      %27 = vector.broadcast %cst_13 : f32 to vector<32x1xf32>
      %c0_14 = arith.constant 0 : index
      %c0_15 = arith.constant 0 : index
      %28 = vector.load %arg6[%c0_14, %c0_15] : memref<32x1xf32, #tpu.memory_space<vmem>>, vector<32x1xf32>
      tpu.vector_store %arg6[%c0_14, %c0_15], %27 {strides = array<i32>} : memref<32x1xf32, #tpu.memory_space<vmem>>, vector<32x1xf32>,
    } else {
    }
    %c0 = arith.constant 0 : index
    %c0_1 = arith.constant 0 : index
    %3 = vector.load %arg2[%c0, %c0_1] : memref<32x32xf32, #tpu.memory_space<vmem>>, vector<32x32xf32>
    %c0_2 = arith.constant 0 : index
    %c0_3 = arith.constant 0 : index
    %4 = vector.load %arg3[%c0_2, %c0_3] : memref<32x32xf32, #tpu.memory_space<vmem>>, vector<32x32xf32>
    %5 = arith.subf %3, %4 : vector<32x32xf32>
    %6 = arith.mulf %5, %5 : vector<32x32xf32>
    %cst = arith.constant dense<0.000000e+00> : vector<32xf32>
    %7 = vector.multi_reduction <add>, %6, %cst [1] : vector<32x32xf32> to vector<32xf32>
    %8 = vector.shape_cast %7 : vector<32xf32> to vector<32x1xf32>
    %c0_4 = arith.constant 0 : index
    %c0_5 = arith.constant 0 : index
    %9 = vector.load %arg4[%c0_4, %c0_5] : memref<32x1xf32, #tpu.memory_space<vmem>>, vector<32x1xf32>
    %10 = arith.mulf %9, %8 : vector<32x1xf32>
    %c1_i32 = arith.constant 1 : i32
    %11 = arith.muli %arg0, %c1_i32 : i32
    %12 = arith.addi %11, %arg1 : i32
    %c32_i32 = arith.constant 32 : i32
    %13 = arith.muli %12, %c32_i32 : i32
    %14 = tpu.iota {dimensions = array<i32: 0>} : vector<32x1xi32>
    %15 = vector.broadcast %13 : i32 to vector<32x1xi32>
    %16 = arith.addi %15, %14 : vector<32x1xi32>
    %c16_i32 = arith.constant 16 : i32
    %17 = vector.broadcast %c16_i32 : i32 to vector<32x1xi32>
    %18 = arith.cmpi slt, %16, %17 : vector<32x1xi32>
    %cst_6 = arith.constant 0.000000e+00 : f32
    %19 = vector.broadcast %cst_6 : f32 to vector<32x1xf32>
    %20 = arith.select %18, %10, %19 : vector<32x1xi1>, vector<32x1xf32>
    %c0_7 = arith.constant 0 : index
    %c0_8 = arith.constant 0 : index
    %21 = vector.load %arg6[%c0_7, %c0_8] : memref<32x1xf32, #tpu.memory_space<vmem>>, vector<32x1xf32>
    %22 = arith.addf %21, %20 : vector<32x1xf32>
    %c0_9 = arith.constant 0 : index
    %c0_10 = arith.constant 0 : index
    %23 = vector.load %arg6[%c0_9, %c0_10] : memref<32x1xf32, #tpu.memory_space<vmem>>, vector<32x1xf32>
    tpu.vector_store %arg6[%c0_9, %c0_10], %22 {strides = array<i32>} : memref<32x1xf32, #tpu.memory_space<vmem>>, vector<32x1xf32>,
    %c0_i32_11 = arith.constant 0 : i32
    %24 = arith.cmpi eq, %arg1, %c0_i32_11 : i32
    %25 = arith.extui %24 : i1 to i32
    %c0_i32_12 = arith.constant 0 : i32
    %26 = arith.cmpi ne, %25, %c0_i32_12 : i32
    scf.if %26 {
      %c0_13 = arith.constant 0 : index
      %c0_14 = arith.constant 0 : index
      %27 = vector.load %arg6[%c0_13, %c0_14] : memref<32x1xf32, #tpu.memory_space<vmem>>, vector<32x1xf32>
      %28 = vector.shape_cast %27 : vector<32x1xf32> to vector<1x32x1xf32>
      %cst_15 = arith.constant dense<0.000000e+00> : vector<1xf32>
      %29 = vector.multi_reduction <add>, %28, %cst_15 [1, 2] : vector<1x32x1xf32> to vector<1xf32>
      %30 = vector.shape_cast %29 : vector<1xf32> to vector<1x1x1xf32>
      %31 = vector.extract %30[0, 0, 0] : f32 from vector<1x1x1xf32>
      %32 = vector.broadcast %31 : f32 to vector<1x8x128xf32>
      %c0_16 = arith.constant 0 : index
      %c0_17 = arith.constant 0 : index
      %c0_18 = arith.constant 0 : index
      %33 = vector.load %arg5[%c0_16, %c0_17, %c0_18] : memref<1x8x128xf32, #tpu.memory_space<vmem>>, vector<1x8x128xf32>
      tpu.vector_store %arg5[%c0_16, %c0_17, %c0_18], %32 {strides = array<i32>} : memref<1x8x128xf32, #tpu.memory_space<vmem>>, vector<1x8x128xf32>,
    } else {
    }
    return
  }
  func.func @transform_0(%arg0: i32, %arg1: i32) -> (i32, i32) {
    %c1_i32 = arith.constant 1 : i32
    %0 = arith.muli %arg0, %c1_i32 : i32
    %1 = arith.addi %0, %arg1 : i32
    %c0_i32 = arith.constant 0 : i32
    %c0_i32_0 = arith.constant 0 : i32
    return %1, %c0_i32 : i32, i32
  }
  func.func @transform_1(%arg0: i32, %arg1: i32) -> (i32, i32) {
    %c1_i32 = arith.constant 1 : i32
    %0 = arith.muli %arg0, %c1_i32 : i32
    %1 = arith.addi %0, %arg1 : i32
    %c0_i32 = arith.constant 0 : i32
    %c0_i32_0 = arith.constant 0 : i32
    return %1, %c0_i32 : i32, i32
  }
  func.func @transform_2(%arg0: i32, %arg1: i32) -> (i32, i32) {
    %c1_i32 = arith.constant 1 : i32
    %0 = arith.muli %arg0, %c1_i32 : i32
    %1 = arith.addi %0, %arg1 : i32
    %c0_i32 = arith.constant 0 : i32
    %c0_i32_0 = arith.constant 0 : i32
    return %1, %c0_i32 : i32, i32
  }
  func.func @transform_3(%arg0: i32, %arg1: i32) -> (i32, i32, i32) {
    %c0_i32 = arith.constant 0 : i32
    %c0_i32_0 = arith.constant 0 : i32
    %c0_i32_1 = arith.constant 0 : i32
    return %arg0, %c0_i32, %c0_i32_0 : i32, i32, i32
  }
}

</mosaic_0001>

<bundles_post_ra>
// kernel: tpu_custom_call.1
= control target key start
LH: loop header
LB: loop body
LE: loop exit
PB: predicated region body
PF: predicated region fallthrough
CT: control target
= control target key end

     0   :  { %8 = vsyncpa [#allocation4], 0  ;;  %s355_s0 = inlined_call_operand.vmem [shape: f32[16,32], index: 0, kind: input, shape index: {}]   ;;  %s356_s1 = inlined_call_operand.hbm [shape: f32[16,32], index: 1, kind: input, shape index: {}]   ;;  %s357_s2 = inlined_call_operand.vmem [shape: f32[16,1], index: 2, kind: input, shape index: {}]   ;;  %s358_s3 = inlined_call_operand.hbm [shape: f32[1,8,128], index: 3, kind: output, shape index: {}]  }
   0x1   :  { %9 = vsyncpa [#allocation5], 0 }
   0x2   :  { %32 = vsyncadd [#allocation4], 256  ;;  %s37_s14 = sshll.u32 %s356_s1, 4  ;;  %s300_s15 = smov [#allocation3]   ;;  %s38_s14 = int_to_ptr.hbm [resolvable:$true] %s37_s14 }
   0x3   :  { %s39_s16 = sshll.u32 %s300_s15, 4  ;;  %s301_s17 = smov 128   ;;  %s40_s16 = int_to_ptr.vmem [resolvable:$true] %s39_s16 }
   0x4   :  { %s302_s18 = smov 8  }
   0x5   :  { %45 = dma.hbm_to_vmem [thread:$0]  %s38_s14, 256, %s40_s16, [#allocation4], %s301_s17, %s301_s17, %s302_s18  }
   0x6   :  { %296 = dma.done.wait [#allocation4], 512  }
   0x7   :  { %297 = vsyncadd [#allocation4], 4294966784  ;;  %vm112_vm0 = vcmask 7168   ;;  %v303_v0 = vmov 0.0   ;;  %v117_v1 = vld [vmem:[%s355_s0] sm:$0xff]  ;;  %v118_v3 = vld [vmem:[%s355_s0 + $0x8] sm:$0xff] }
   0x8   :  { %113 = vst.msk [vmem:[#allocation2] sm:$0xff] %vm112_vm0, %v303_v0  ;;  %v121_v2 = vld [vmem:[#allocation3] sm:$0xff]  ;;  %v122_v5 = vld [vmem:[#allocation3 + $0x8] sm:$0xff]  ;;  %vm133_vm1 = vcmask 261120   ;;  %s219_s28 = sshll.u32 %s358_s3, 4  ;;  %s220_s28 = int_to_ptr.hbm [resolvable:$true] %s219_s28 }
   0x9   :  { %115 = vst.msk [vmem:[#allocation2 + $0x10] sm:$0xff] %vm112_vm0, %v303_v0  ;;  %v125_v4 = vsub.f32 %v117_v1, %v121_v2  ;;  %v126_v7 = vsub.f32 %v118_v3, %v122_v5  ;;  %v146_v13 = vld [vmem:[%s357_s2] sm:$0xff]  ;;  %v147_v18 = vld [vmem:[%s357_s2 + $0x8] sm:$0xff]  ;;  %s304_s2 = smov [#allocation6]  }
   0xa   :  { %116 = vst.msk [vmem:[#allocation2 + $0x18] sm:$0xff] %vm112_vm0, %v303_v0  ;;  %s217_s25 = sshll.u32 %s304_s2, 4  ;;  %s218_s25 = int_to_ptr.vmem [resolvable:$true] %s217_s25 }
   0xb   :  { %114 = vst.msk [vmem:[#allocation2 + $0x8] sm:$0xff] %vm112_vm0, %v303_v0  ;;  %v129_v6 = vmul.f32 %v125_v4, %v125_v4  ;;  %v130_v9 = vmul.f32 %v126_v7, %v126_v7 }
   0xd   :  { %v134_v8 = vsel %vm133_vm1, %v129_v6, 0.0  ;;  %v137_v10 = vsel %vm133_vm1, %v130_v9, 0.0 }
   0xe   :  { %135 = vadd.xlane.f32.xlu0 %v134_v8 }
   0xf   :  { %v174_v15 = vld [vmem:[#allocation2] sm:$0xff] }
  0x10   :  { %v176_v11 = vld [vmem:[#allocation2 + $0x10] sm:$0xff] }
  0x11   :  { %v177_v12 = vld [vmem:[#allocation2 + $0x18] sm:$0xff]  ;;  %185 = vst.msk [vmem:[#allocation2 + $0x10] sm:$0xff] %vm112_vm0, %v176_v11 }
  0x12   :  { %186 = vst.msk [vmem:[#allocation2 + $0x18] sm:$0xff] %vm112_vm0, %v177_v12  ;;  %v175_v20 = vld [vmem:[#allocation2 + $0x8] sm:$0xff] }
  0x16   :  { %138 = vadd.xlane.f32.xlu0 %v137_v10 }
  0x18   :  { %v192_v24 = vld [vmem:[#allocation2 + $0x10] sm:$0xff] }
  0x19   :  { %v193_v26 = vld [vmem:[#allocation2 + $0x18] sm:$0xff]  ;;  %v197_v29 = vsel %vm112_vm0, %v192_v24, 0.0 }
  0x1a   :  { %v199_v31 = vsel %vm112_vm0, %v193_v26, 0.0 }
  0x81   :  { %v136_v14 = vpop.xlane.xlu0 %135 }
  0x82   :  { %v150_v16 = vmul.f32 %v146_v13, %v136_v14 }
  0x84   :  { %v178_v17 = vadd.f32 %v174_v15, %v150_v16 }
  0x86   :  { %183 = vst.msk [vmem:[#allocation2] sm:$0xff] %vm112_vm0, %v178_v17 }
  0x89   :  { %v139_v19 = vpop.xlane.xlu0 %138 }
  0x8a   :  { %v151_v21 = vmul.f32 %v147_v18, %v139_v19 }
  0x8c   :  { %v179_v22 = vadd.f32 %v175_v20, %v151_v21 }
  0x8d   :  { %v190_v23 = vld [vmem:[#allocation2] sm:$0xff] }
  0x8e   :  { %184 = vst.msk [vmem:[#allocation2 + $0x8] sm:$0xff] %vm112_vm0, %v179_v22  ;;  %v194_v27 = vsel %vm112_vm0, %v190_v23, 0.0 }
  0x95   :  { %v191_v25 = vld [vmem:[#allocation2 + $0x8] sm:$0xff] }
  0x96   :  { %v195_v28 = vsel %vm112_vm0, %v191_v25, 0.0 }
  0x97   :  { %v196_v30 = vadd.f32 %v195_v28, %v194_v27 }
  0x99   :  { %v198_v32 = vadd.f32 %v197_v29, %v196_v30 }
  0x9b   :  { %v200_v33 = vadd.f32 %v199_v31, %v198_v32 }
  0x9d   :  { %201 = vadd.xlane.f32.xlu1 %v200_v33 }
 0x110   :  { %v202_v34 = vpop.xlane.xlu1 %201 }
 0x111   :  { %v203_v35 = vrot.slane %v202_v34, 4 }
 0x113   :  { %v204_v36 = vadd.f32 %v203_v35, %v202_v34 }
 0x115   :  { %v205_v37 = vrot.slane %v204_v36, 2 }
 0x117   :  { %v206_v38 = vadd.f32 %v205_v37, %v204_v36 }
 0x119   :  { %v207_v39 = vrot.slane %v206_v38, 1 }
 0x11b   :  { %v208_v40 = vadd.f32 %v207_v39, %v206_v38 }
 0x11d   :  { %241 = vpush %v208_v40 }
 0x14e   :  { %s242_s29 = spop %241 }
 0x14f   :  { %v210_v41 = vstv %s242_s29 }
 0x150   :  { %211 = vst [vmem:[#allocation6] sm:$0xff] %v210_v41 }
 0x151   :  { %222 = dma.vmem_to_hbm [thread:$0]  %s218_s25, 128, %s220_s28, [#allocation5]  }
 0x152   :  { %298 = dma.done.wait [#allocation5], 128  }
 0x153   :  { %299 = vsyncadd [#allocation5], 4294967168 }
 0x154   :  { %227 = vsyncpa [#allocation4], 1 }
 0x155   :  { %228 = vsyncpa [#allocation5], 1 }

</bundles_post_ra>
